<compile_context>
chip_gen: v7x
topology: tpu7x:2x2x1
jax: 0.10.0
libtpu: 0.0.40
codegen_flags: <defaults>
</compile_context>

<pallas_src>
import jax
import jax.numpy as jnp
from jax.experimental import pallas as pl
from jax.experimental.pallas import tpu as pltpu


def _se_kernel_spatial_lanes(x_ref, w1_ref, w2_ref, o_ref):
    # x_ref/o_ref: (TB, C, HW)   w1_ref: (C, Cr)   w2_ref: (Cr, C)
    x = x_ref[...]                                              # native dtype
    # Squeeze: global average pool over spatial (lane reduce), f32 accumulation.
    pooled = jnp.mean(x.astype(jnp.float32), axis=2)            # (TB, C)
    # Excitation: Linear -> ReLU -> Linear -> Sigmoid (batched over TB).
    h = jnp.maximum(
        jnp.dot(pooled, w1_ref[...], preferred_element_type=jnp.float32), 0.0)
    y = jnp.dot(h, w2_ref[...], preferred_element_type=jnp.float32)
    s = jax.nn.sigmoid(y)                                       # (TB, C)
    # Scale: broadcast over lanes, multiply in native dtype (no x upcast).
    o_ref[...] = (x * s.astype(x.dtype)[:, :, None]).astype(o_ref.dtype)


def _se_kernel_channel_lanes(x_ref, w1_ref, w2_ref, o_ref):
    # x_ref/o_ref: (TB, HW, C)   w1_ref: (C, Cr)   w2_ref: (Cr, C)
    x = x_ref[...]
    # Squeeze: pool over spatial (sublane reduce), f32 accumulation.
    pooled = jnp.mean(x.astype(jnp.float32), axis=1)            # (TB, C)
    h = jnp.maximum(
        jnp.dot(pooled, w1_ref[...], preferred_element_type=jnp.float32), 0.0)
    y = jnp.dot(h, w2_ref[...], preferred_element_type=jnp.float32)
    s = jax.nn.sigmoid(y)                                       # (TB, C)
    # Scale: stride-0 sublane broadcast of the (1, C) row, native dtype.
    o_ref[...] = (x * s.astype(x.dtype)[:, None, :]).astype(o_ref.dtype)


def _pick_batch_tile(B, per_sample_bytes, target_bytes):
    """Largest TB dividing B with TB*per_sample <= target, keeping >=2 grid
    steps when possible (so the parallel batch axis can shard across v7x's
    two TensorCores)."""
    best = 1
    for tb in range(1, B + 1):
        if tb * per_sample_bytes > target_bytes:
            break
        if B % tb != 0:
            continue
        if B // tb >= 2 or B == 1:
            best = tb
    return best


def se_layer(x, w1, w2, *, target_block_bytes=4 << 20):
    """x: (B, C, H, W); w1: (Cr, C); w2: (C, Cr)  (PyTorch Linear weight layout)."""
    B, C, H, W = x.shape
    Cr = w1.shape[0]
    HW = H * W
    itemsize = x.dtype.itemsize

    # Layout choice: put a 128-aligned axis on lanes for unmasked stores.
    channel_lanes = (HW % 128 != 0) and (C % 128 == 0)

    per_sample_bytes = C * HW * itemsize
    TB = _pick_batch_tile(B, per_sample_bytes, target_block_bytes)
    grid = (B // TB,)

    # Pre-transposed weights: pooled(TB,C) @ w1_t(C,Cr); h(TB,Cr) @ w2_t(Cr,C).
    w1_t = w1.T  # (C, Cr)
    w2_t = w2.T  # (Cr, C)

    if channel_lanes:
        x_flat = x.reshape(B, C, HW).transpose(0, 2, 1)         # (B, HW, C)
        kernel = _se_kernel_channel_lanes
        blk = (TB, HW, C)
    else:
        x_flat = x.reshape(B, C, HW)                            # (B, C, HW)
        kernel = _se_kernel_spatial_lanes
        blk = (TB, C, HW)

    # VMEM budget: 2x(in block) + 2x(out block) double-buffering + weights +
    # headroom, capped below v7x's 64 MiB physical VMEM (v5e/v6e have 128 MiB).
    block_bytes = TB * per_sample_bytes
    weight_bytes = 2 * C * Cr * w1.dtype.itemsize
    needed = 4 * block_bytes + 2 * weight_bytes + (4 << 20)
    vmem_limit = int(min(max(needed, 32 << 20), 48 << 20))

    cost = pl.CostEstimate(
        flops=4 * B * C * Cr,                          # two bias-free matmuls
        transcendentals=2 * B * C,                     # sigmoid
        bytes_accessed=2 * B * C * HW * itemsize + 2 * weight_bytes,
    )

    out_flat = pl.pallas_call(
        kernel,
        out_shape=jax.ShapeDtypeStruct(x_flat.shape, x.dtype),
        grid_spec=pltpu.PrefetchScalarGridSpec(
            num_scalar_prefetch=0,
            grid=grid,
            in_specs=[
                pl.BlockSpec(blk, lambda i: (i, 0, 0)),
                pl.BlockSpec((C, Cr), lambda i: (0, 0)),
                pl.BlockSpec((Cr, C), lambda i: (0, 0)),
            ],
            out_specs=pl.BlockSpec(blk, lambda i: (i, 0, 0)),
        ),
        compiler_params=pltpu.CompilerParams(
            dimension_semantics=("parallel",),
            vmem_limit_bytes=vmem_limit,
        ),
        cost_estimate=cost,
    )(x_flat, w1_t, w2_t)

    if channel_lanes:
        return out_flat.transpose(0, 2, 1).reshape(B, C, H, W)
    return out_flat.reshape(B, C, H, W)


def se_layer_ref(x, w1, w2):
    """Pure-JAX reference matching the PyTorch forward."""
    y = jnp.mean(x, axis=(2, 3))                 # (B, C)
    y = jnp.maximum(y @ w1.T, 0.0)               # (B, Cr)
    y = jax.nn.sigmoid(y @ w2.T)                 # (B, C)
    return x * y[:, :, None, None]


if __name__ == "__main__":
    key = jax.random.PRNGKey(0)
    reduction = 16

    # Case 1: HW is 128-aligned -> spatial-on-lanes layout.
    B, C, H, W = 2, 64, 16, 16
    Cr = C // reduction
    kx, k1, k2, key = jax.random.split(key, 4)
    x = jax.random.normal(kx, (B, C, H, W), dtype=jnp.float32)
    w1 = jax.random.normal(k1, (Cr, C), dtype=jnp.float32) * (1.0 / jnp.sqrt(C))
    w2 = jax.random.normal(k2, (C, Cr), dtype=jnp.float32) * (1.0 / jnp.sqrt(Cr))
    out = jax.block_until_ready(se_layer(x, w1, w2))
    ref = jax.block_until_ready(se_layer_ref(x, w1, w2))
    assert out.shape == (B, C, H, W)
    assert jnp.allclose(out, ref, atol=1e-5, rtol=1e-5), "mismatch (spatial-lanes)"

    # Case 2: HW not 128-aligned (7x7), C 128-aligned -> channel-on-lanes layout.
    B2, C2, H2, W2 = 2, 128, 7, 7
    Cr2 = C2 // reduction
    kx2, k12, k22, key = jax.random.split(key, 4)
    x2 = jax.random.normal(kx2, (B2, C2, H2, W2), dtype=jnp.float32)
    w12 = jax.random.normal(k12, (Cr2, C2), dtype=jnp.float32) * (1.0 / jnp.sqrt(C2))
    w22 = jax.random.normal(k22, (C2, Cr2), dtype=jnp.float32) * (1.0 / jnp.sqrt(Cr2))
    out2 = jax.block_until_ready(se_layer(x2, w12, w22))
    ref2 = jax.block_until_ready(se_layer_ref(x2, w12, w22))
    assert out2.shape == (B2, C2, H2, W2)
    assert jnp.allclose(out2, ref2, atol=1e-5, rtol=1e-5), "mismatch (channel-lanes)"

    print("KERNEL_OK")
</pallas_src>

<mosaic_0001>
module attributes {stable_mosaic.version = 11 : i64} {
  func.func @_se_kernel_spatial_lanes(%arg0: i32, %arg1: memref<1x64x256xf32, #tpu.memory_space<vmem>>, %arg2: memref<64x4xf32, #tpu.memory_space<vmem>>, %arg3: memref<4x64xf32, #tpu.memory_space<vmem>>, %arg4: memref<1x64x256xf32, #tpu.memory_space<vmem>>) attributes {dimension_semantics = [#tpu.dimension_semantics<parallel>], iteration_bounds = array<i64: 2>, scalar_prefetch = 0 : i64, scratch_operands = 0 : i64, tpu.core_type = #tpu.core_type<tc>, window_params = [{transform_indices = @transform_0, window_bounds = array<i64: 1, 64, 256>}, {pipeline_mode = #tpu.pipeline_mode<synchronous>, transform_indices = @transform_1, window_bounds = array<i64: 64, 4>}, {pipeline_mode = #tpu.pipeline_mode<synchronous>, transform_indices = @transform_2, window_bounds = array<i64: 4, 64>}, {transform_indices = @transform_3, window_bounds = array<i64: 1, 64, 256>}]} {
    %c0 = arith.constant 0 : index
    %c0_0 = arith.constant 0 : index
    %c0_1 = arith.constant 0 : index
    %0 = vector.load %arg1[%c0, %c0_0, %c0_1] : memref<1x64x256xf32, #tpu.memory_space<vmem>>, vector<1x64x256xf32>
    %cst = arith.constant dense<0.000000e+00> : vector<1x64xf32>
    %1 = vector.multi_reduction <add>, %0, %cst [2] : vector<1x64x256xf32> to vector<1x64xf32>
    %cst_2 = arith.constant 2.560000e+02 : f32
    %2 = vector.broadcast %cst_2 : f32 to vector<1x64xf32>
    %3 = arith.divf %1, %2 : vector<1x64xf32>
    %c0_3 = arith.constant 0 : index
    %c0_4 = arith.constant 0 : index
    %4 = vector.load %arg2[%c0_3, %c0_4] : memref<64x4xf32, #tpu.memory_space<vmem>>, vector<64x4xf32>
    %cst_5 = arith.constant dense<0.000000e+00> : vector<1x4xf32>
    %5 = tpu.matmul %3, %4, %cst_5 {dimension_numbers = #tpu.dot_dimension_numbers<[1], [0], [0], [1], [0, 0, 1, 1], [], []>} : vector<1x64xf32>, vector<64x4xf32>, vector<1x4xf32> -> vector<1x4xf32>
    %cst_6 = arith.constant 0.000000e+00 : f32
    %6 = vector.broadcast %cst_6 : f32 to vector<1x4xf32>
    %7 = arith.maximumf %5, %6 : vector<1x4xf32>
    %c0_7 = arith.constant 0 : index
    %c0_8 = arith.constant 0 : index
    %8 = vector.load %arg3[%c0_7, %c0_8] : memref<4x64xf32, #tpu.memory_space<vmem>>, vector<4x64xf32>
    %cst_9 = arith.constant dense<0.000000e+00> : vector<1x64xf32>
    %9 = tpu.matmul %7, %8, %cst_9 {dimension_numbers = #tpu.dot_dimension_numbers<[1], [0], [0], [1], [0, 0, 1, 1], [], []>} : vector<1x4xf32>, vector<4x64xf32>, vector<1x64xf32> -> vector<1x64xf32>
    %10 = arith.negf %9 : vector<1x64xf32>
    %11 = math.exp %10 : vector<1x64xf32>
    %cst_10 = arith.constant 1.000000e+00 : f32
    %12 = vector.broadcast %cst_10 : f32 to vector<1x64xf32>
    %13 = arith.addf %12, %11 : vector<1x64xf32>
    %14 = arith.divf %12, %13 : vector<1x64xf32>
    %15 = vector.shape_cast %14 : vector<1x64xf32> to vector<1x64x1xf32>
    %16 = vector.broadcast %15 : vector<1x64x1xf32> to vector<1x64x256xf32>
    %17 = arith.mulf %0, %16 : vector<1x64x256xf32>
    %c0_11 = arith.constant 0 : index
    %c0_12 = arith.constant 0 : index
    %c0_13 = arith.constant 0 : index
    %18 = vector.load %arg4[%c0_11, %c0_12, %c0_13] : memref<1x64x256xf32, #tpu.memory_space<vmem>>, vector<1x64x256xf32>
    tpu.vector_store %arg4[%c0_11, %c0_12, %c0_13], %17 {strides = array<i32>} : memref<1x64x256xf32, #tpu.memory_space<vmem>>, vector<1x64x256xf32>,
    return
  }
  func.func @transform_0(%arg0: i32) -> (i32, i32, i32) {
    %c0_i32 = arith.constant 0 : i32
    %c0_i32_0 = arith.constant 0 : i32
    %c0_i32_1 = arith.constant 0 : i32
    return %arg0, %c0_i32, %c0_i32_0 : i32, i32, i32
  }
  func.func @transform_1(%arg0: i32) -> (i32, i32) {
    %c0_i32 = arith.constant 0 : i32
    %c0_i32_0 = arith.constant 0 : i32
    %c0_i32_1 = arith.constant 0 : i32
    return %c0_i32, %c0_i32_0 : i32, i32
  }
  func.func @transform_2(%arg0: i32) -> (i32, i32) {
    %c0_i32 = arith.constant 0 : i32
    %c0_i32_0 = arith.constant 0 : i32
    %c0_i32_1 = arith.constant 0 : i32
    return %c0_i32, %c0_i32_0 : i32, i32
  }
  func.func @transform_3(%arg0: i32) -> (i32, i32, i32) {
    %c0_i32 = arith.constant 0 : i32
    %c0_i32_0 = arith.constant 0 : i32
    %c0_i32_1 = arith.constant 0 : i32
    return %arg0, %c0_i32, %c0_i32_0 : i32, i32, i32
  }
}

</mosaic_0001>

<bundles_post_ra>
// kernel: tpu_custom_call.1
= control target key start
LH: loop header
LB: loop body
LE: loop exit
PB: predicated region body
PF: predicated region fallthrough
CT: control target
= control target key end

     0   :  { %8 = vsyncpa [#allocation3], 0  ;;  %s1161_s0 = inlined_call_operand.hbm [shape: f32[2,64,256], index: 0, kind: input, shape index: {}]   ;;  %s1162_s1 = inlined_call_operand.vmem [shape: f32[64,4], index: 1, kind: input, shape index: {}]   ;;  %s1163_s2 = inlined_call_operand.vmem [shape: f32[4,64], index: 2, kind: input, shape index: {}]   ;;  %s1164_s3 = inlined_call_operand.hbm [shape: f32[2,64,256], index: 3, kind: output, shape index: {}]  }
   0x1   :  { %10 = vsyncpa [#allocation3 + $0x1], 0 }
   0x2   :  { %11 = vsyncpa [#allocation4], 0 }
   0x3   :  { %13 = vsyncpa [#allocation4 + $0x1], 0  ;;  %s873_s12 = smov 0   ;;  %s875_s13 = smov 0  }
   0x4   :  { %s877_s14 = smov 0   ;;  %s879_s15 = smov 0  }
   0x5 LB: > { %s894_s16 = sadd.s32 4294967295, %s842_s15   ;;  %s622_s17 = sadd.s32 4294967294, %s842_s15   ;;  %s842_s15 = sphi %s879_s15, %s1177_s15   ;;  %s838_s14 = sphi %s877_s14, %s1176_s14   ;;  %s834_s13 = sphi %s875_s13, %s1175_s13   ;;  %s830_s12 = sphi %s873_s12, %s1174_s12  }
   0x6   : > { %s898_s18 = sadd.s32 1, %s842_s15   ;;  %s26_s19 = sadd.s32 1, %s838_s14 }
   0x7   : > { %s23_s20 = ssub.s32 %s842_s15, %s898_s18  ;;  %p33_p0 = scmp.ne.s32.totalorder %s838_s14, %s834_s13 }
   0x8   : > { %p24_p1 = scmp.eq.s32.totalorder %s23_s20, 0  ;;  %p34_p2 = scmp.eq.s32.totalorder %s842_s15, 0 }
   0x9   : > { %p39_p3 = scmp.ne.s32.totalorder %s834_s13, %s830_s12  ;;  %p40_p4 = scmp.eq.s32.totalorder %s894_s16, 0 }
   0xa   : > { %s910_s21 = scalar_select %p24_p1, %s838_s14, %s26_s19  }
   0xb   : > { %p912_p5 = por %p34_p2, %p33_p0  ;;  %p916_p6 = por %p40_p4, %p39_p3 }
   0xc   : > { %p105_p7 = scmp.eq.s32.totalorder %s894_s16, 1  ;;  %p111_p8 = scmp.eq.s32.totalorder %s622_s17, 1 }
   0xd   : > { %p701_p10 = scmp.lt.s32.totalorder %s842_s15, 2  ;;  %s137_s26 = sand.u32 1, %s838_s14  }
   0xe   : > { %p923_p11 = por %p105_p7, %p33_p0  ;;  %p927_p12 = por %p111_p8, %p39_p3 }
   0xf   : > { %s640_s27 = sshll.u32 %s842_s15, 11  ;;  %s625_s28 = sshll.u32 %s137_s26, 7 }
  0x10   : > { %s1168_s24 = scalar_select %p923_p11, 1, 0 }
  0x11   : > { %s1169_s25 = scalar_select %p927_p12, 1, 0 }
  0x12   : > { %s936_s4 = scalar_lea.hbm %s1161_s0, %s640_s27  ;;  %s141_s5 = scalar_lea.vmem [#allocation2], %s625_s28 }
  0x13   : > { %s148_s6 = sshll.u32 %s141_s5, 4  ;;  %p940_p13 = pnand %p701_p10, %p912_p5  ;;  %s944_s6 = int_to_ptr.vmem [resolvable:$true] %s148_s6 }
  0x14   : > { %s946_s8 = scalar_lea.sflag [#allocation3], %s137_s26  ;;  %s746_s9 = scalar_lea.hbm %s936_s4, 2048 }
  0x15   : > { %p747_p0 = scmp.ne.s32.totalorder %s936_s4, %s746_s9  ;;  %p748_p1 = pneg %p940_p13 }
  0x16   : > { %s751_s17 = scalar_lea.hbm %s1161_s0, 4096  ;;  %p752_p4 = scmp.lt.u32.totalorder %s936_s4, %s1161_s0 }
  0x17   : > { %p749_p2 = pnand %p748_p1, %p747_p0  ;;  %p753_p5 = scmp.lt.u32.totalorder %s751_s17, %s746_s9 }
  0x18   : > { %p755_p8 = scmp.lt.u32.totalorder %s746_s9, %s936_s4 }
  0x19   : > { %p750_p3 = pneg %p749_p2  ;;  %p754_p7 = por %p753_p5, %p752_p4 }
  0x1b   : > { %p756_p10 = por %p755_p8, %p754_p7 }
  0x1d   : > { %p757_p9 = pnand %p756_p10, %p750_p3 }
  0x1f   : > { %760 = shalt.err (!%p757_p9)
}
  0x20   : > { %s761_s22 = scalar_lea.vmem %s944_s6, 2048  ;;  %s844_s26 = smov [#allocation2]  }
  0x21   : > { %p762_p0 = scmp.ne.s32.totalorder %s944_s6, %s761_s22  ;;  %s766_s27 = sshll.u32 %s844_s26, 4  ;;  %s767_s27 = int_to_ptr.vmem [resolvable:$false] %s766_s27 }
  0x22   : > { %s768_s28 = scalar_lea.vmem %s767_s27, 4096  ;;  %p769_p11 = scmp.lt.s32.totalorder %s944_s6, %s767_s27 }
  0x23   : > { %p764_p2 = pnand %p762_p0, %p748_p1  ;;  %p770_p4 = scmp.lt.s32.totalorder %s768_s28, %s761_s22 }
  0x25   : > { %p765_p12 = pneg %p764_p2  ;;  %p771_p5 = por %p770_p4, %p769_p11 }
  0x27   : > { %p772_p7 = pnand %p771_p5, %p765_p12 }
  0x29   : > { %775 = shalt.err (!%p772_p7)
}
  0x2a   : > { %s845_s29 = smov 256   ;;  %s846_s30 = smov 16  }
  0x2b   : > { %696 = dma.hbm_to_vmem [thread:$0]  (!%p940_p13), %s936_s4, 2048, %s944_s6, %s946_s8, %s845_s29, %s845_s29, %s846_s30  }
  0x2c   : > { %p628_p9 = scmp.ge.s32.totalorder %s842_s15, 1  ;;  %p156_p1 = scmp.lt.s32.totalorder %s842_s15, 3 }
  0x2e   : > { %p157_p3 = pnand %p628_p9, %p156_p1 }
  0x2f   : > { %s977_s5 = sand.u32 (!%p157_p3), 1, %s834_s13  }
  0x30   : > { %160 = sbr.rel (%p157_p3) target bundleno = 821 (0x335), region = 32  ;;  %s629_s9 = sshll.u32 (!%p157_p3), %s977_s5, 7 }
  0x31   : > { %s163_s10 = scalar_lea.sflag (!%p157_p3), [#allocation3], %s977_s5  ;;  %s166_s11 = scalar_lea.vmem (!%p157_p3), [#allocation2], %s629_s9 }
  0x37   : > { %821 = dma.done.wait (%p916_p6), %s163_s10, 2048  }
  0x38   : > { %823 = vsyncadd (%p916_p6), %s163_s10, 4294965248  ;;  %v987_v0 = vld [vmem:[%s166_s11] sm:$0xff]  ;;  %v989_v1 = vld [vmem:[%s166_s11 + $0x8] sm:$0xff]  ;;  %v847_v27 = vmov 0.0|0.0   ;;  %vm848_vm0 = vmmov 0   ;;  %v849_v37 = vmov 0.0   ;;  %v254_v38 = vlaneseq }
  0x39   : > { %v991_v2 = vld [vmem:[%s166_s11 + $0x20] sm:$0xff]  ;;  %v205_v3 = vadd.f32 %v989_v1, %v987_v0  ;;  %v995_v4 = vld [vmem:[%s166_s11 + $0x28] sm:$0xff]  ;;  %v997_v5 = vld [vmem:[%s166_s11 + $0x10] sm:$0xff]  ;;  %677 = vmatprep.subr.bf16.mxu0 %v847_v27  ;;  %669 = vmatprep.mubr.msk.f32.mxu0 %vm848_vm0, %v849_v37  ;;  %vm265_vm1 = vcmask 130112   ;;  %vm272_vm2 = vcmask 195712   ;;  %vm279_vm3 = vcmask 261312  }
  0x3a   : > { %v999_v6 = vld [vmem:[%s166_s11 + $0x18] sm:$0xff]  ;;  %v211_v7 = vadd.f32 %v995_v4, %v991_v2  ;;  %v1003_v8 = vld [vmem:[%s166_s11 + $0x30] sm:$0xff]  ;;  %v1011_v12 = vld [vmem:[%s166_s11 + $0x40] sm:$0xff]  ;;  %672 = vmatprep.subr.mxu1 %v849_v37  ;;  %674 = vmatprep.mubr.msk.f32.mxu1 %vm848_vm0, %v849_v37  ;;  %v255_v39 = vand.u32 127, %v254_v38  ;;  %v1059_v40 = vshrl.u32 %v254_v38, 7  ;;  %vm286_vm4 = vcmask 326912  }
  0x3b   : > { %v1005_v9 = vld [vmem:[%s166_s11 + $0x38] sm:$0xff]  ;;  %206 = vadd.xlane.f32.xlu0 %v205_v3  ;;  %v208_v10 = vadd.f32 %v999_v6, %v997_v5  ;;  %v1013_v13 = vld [vmem:[%s166_s11 + $0x48] sm:$0xff]  ;;  %v1015_v14 = vld [vmem:[%s166_s11 + $0x50] sm:$0xff]  ;;  %vm293_vm5 = vcmask 392512   ;;  %vm300_vm6 = vcmask 458112   ;;  %vm307_vm7 = vcmask 523712  }
  0x3c   : > { %212 = vadd.xlane.f32.xlu1 %v211_v7  ;;  %v214_v11 = vadd.f32 %v1005_v9, %v1003_v8  ;;  %v1017_v15 = vld [vmem:[%s166_s11 + $0x58] sm:$0xff]  ;;  %v217_v16 = vadd.f32 %v1013_v13, %v1011_v12  ;;  %v1023_v18 = vld [vmem:[%s166_s11 + $0x60] sm:$0xff]  ;;  %v1025_v19 = vld [vmem:[%s166_s11 + $0x68] sm:$0xff]  ;;  %v260_v41 = vadd.s32 4294967288, %v255_v39  ;;  %v267_v43 = vadd.s32 4294967280, %v255_v39  ;;  %s1080_s6 = scalar_lea.vmem [#allocation5], %s629_s9 }
  0x3d   : > { %v220_v17 = vadd.f32 %v1017_v15, %v1015_v14  ;;  %v1027_v20 = vld [vmem:[%s166_s11 + $0x70] sm:$0xff]  ;;  %v1029_v21 = vld [vmem:[%s166_s11 + $0x78] sm:$0xff]  ;;  %v223_v22 = vadd.f32 %v1025_v19, %v1023_v18  ;;  %v238_v24 = vld [vmem:[%s1162_s1] sm:$0xff]  ;;  %v274_v44 = vadd.s32 4294967272, %v255_v39  ;;  %v258_v46 = vsub.s32 %v255_v39, %v1059_v40  ;;  %s641_s9 = sshll.u32 %s894_s16, 11  ;;  %s549_s7 = sshll.u32 %s1080_s6, 4  ;;  %s1113_s7 = int_to_ptr.vmem [resolvable:$true] %s549_s7 }
  0x3e   : > { %v226_v23 = vadd.f32 %v1029_v21, %v1027_v20  ;;  %v239_v25 = vld [vmem:[%s1162_s1 + $0x8] sm:$0xff]  ;;  %v240_v28 = vld [vmem:[%s1162_s1 + $0x10] sm:$0xff]  ;;  %v241_v29 = vld [vmem:[%s1162_s1 + $0x18] sm:$0xff]  ;;  %v263_v48 = vsub.s32 %v260_v41, %v1059_v40  ;;  %v281_v49 = vadd.s32 4294967264, %v255_v39  ;;  %v270_v50 = vsub.s32 %v267_v43, %v1059_v40  ;;  %s1111_s19 = scalar_lea.hbm %s1164_s3, %s641_s9  ;;  %s536_s16 = scalar_lea.sflag [#allocation4], %s977_s5 }
  0x3f   : > { %209 = vadd.xlane.f32.xlu0 %v208_v10  ;;  %v678_v26 = vpack.c.bf16 %v239_v25, %v238_v24  ;;  %v681_v30 = vpack.c.bf16 %v241_v29, %v240_v28  ;;  %v242_v31 = vld [vmem:[%s1162_s1 + $0x20] sm:$0xff]  ;;  %v243_v32 = vld [vmem:[%s1162_s1 + $0x28] sm:$0xff]  ;;  %v244_v34 = vld [vmem:[%s1162_s1 + $0x30] sm:$0xff]  ;;  %v277_v53 = vsub.s32 %v274_v44, %v1059_v40  ;;  %v288_v54 = vadd.s32 4294967256, %v255_v39  ;;  %s776_s20 = scalar_lea.vmem %s1113_s7, 2048  ;;  %p1171_p11 = scmp.ne.s32.totalorder %s1168_s24, 0 }
  0x40   : > { %215 = vadd.xlane.f32.xlu1 %v214_v11  ;;  %v684_v33 = vpack.c.bf16 %v243_v32, %v242_v31  ;;  %v245_v35 = vld [vmem:[%s1162_s1 + $0x38] sm:$0xff]  ;;  %v284_v60 = vsub.s32 %v281_v49, %v1059_v40  ;;  %v295_v61 = vadd.s32 4294967248, %v255_v39  ;;  %v302_v10 = vadd.s32 4294967240, %v255_v39  ;;  %v383_v39 = vld [vmem:[%s1163_s2] sm:$0xf]  ;;  %p777_p6 = scmp.ne.s32.totalorder %s1113_s7, %s776_s20  ;;  %s850_s22 = smov [#allocation5]  }
  0x41   : > { %679 = vmatpush3.bf16.msra.mxu0 %v678_v26  ;;  %v687_v36 = vpack.c.bf16 %v245_v35, %v244_v34  ;;  %v291_v7 = vsub.s32 %v288_v54, %v1059_v40  ;;  %vm309_vm8 = vcmask 523264   ;;  %vm388_vm9 = vcmask 1043456   ;;  %s780_s26 = sshll.u32 %s850_s22, 4  ;;  %s781_s26 = int_to_ptr.vmem [resolvable:$false] %s780_s26 }
  0x42   : > { %680 = vmatprep.subr.bf16.mxu0 %v847_v27  ;;  %v298_v26 = vsub.s32 %v295_v61, %v1059_v40  ;;  %v305_v29 = vsub.s32 %v302_v10, %v1059_v40  ;;  %673 = vmatpush3.msk.msra.mxu1 %vm388_vm9, %v383_v39  ;;  %vm384_vm10 = vcmask 31744   ;;  %v470_v49 = vsub.s32 0, %v1059_v40  ;;  %p778_p12 = pnand %p777_p6, %p1171_p11  ;;  %s782_s27 = scalar_lea.vmem %s781_s26, 4096 }
  0x43   : > { %218 = vadd.xlane.f32.xlu0 %v217_v16  ;;  %p783_p8 = scmp.lt.s32.totalorder %s1113_s7, %s781_s26  ;;  %p784_p10 = scmp.lt.s32.totalorder %s782_s27, %s776_s20 }
  0x44   : > { %221 = vadd.xlane.f32.xlu1 %v220_v17  ;;  %p779_p13 = pneg %p778_p12 }
  0x45   : > { %682 = vmatpush3.bf16.msra.mxu0 %v681_v30  ;;  %p785_p0 = por %p784_p10, %p783_p8 }
  0x46   : > { %683 = vmatprep.subr.bf16.mxu0 %v847_v27 }
  0x47   : > { %224 = vadd.xlane.f32.xlu0 %v223_v22  ;;  %p786_p2 = pnand %p785_p0, %p779_p13 }
  0x48   : > { %227 = vadd.xlane.f32.xlu1 %v226_v23 }
  0x49   : > { %685 = vmatpush3.bf16.msra.mxu0 %v684_v33 }
  0x4a   : > { %686 = vmatprep.subr.bf16.mxu0 %v847_v27 }
  0x4d   : > { %688 = vmatpush3.bf16.msra.mxu0 %v687_v36 }
  0xc8   : > { %v207_v42 = vpop.xlane.xlu0 %206 }
  0xc9   : > { %v213_v45 = vpop.xlane.xlu1 %212  ;;  %v230_v47 = vmul.f32 0.00390625, %v207_v42 }
  0xca   : > { %v232_v51 = vmul.f32 0.00390625, %v213_v45 }
  0xcb   : > { %v259_v58 = vrot.slane %v230_v47, %v258_v46 }
  0xcc   : > { %v210_v52 = vpop.xlane.xlu0 %209  ;;  %v271_v62 = vrot.slane %v232_v51, %v270_v50 }
  0xcd   : > { %v231_v55 = vmul.f32 0.00390625, %v210_v52  ;;  %v216_v56 = vpop.xlane.xlu1 %215 }
  0xce   : > { %v233_v57 = vmul.f32 0.00390625, %v216_v56 }
  0xcf   : > { %v264_v59 = vrot.slane %v231_v55, %v263_v48 }
  0xd0   : > { %v278_v63 = vrot.slane %v233_v57, %v277_v53  ;;  %v219_v3 = vpop.xlane.xlu0 %218 }
  0xd1   : > { %v266_v11 = vsel %vm265_vm1, %v264_v59, %v259_v58  ;;  %v234_v16 = vmul.f32 0.00390625, %v219_v3  ;;  %v222_v17 = vpop.xlane.xlu1 %221 }
  0xd2   : > { %v273_v22 = vsel %vm272_vm2, %v271_v62, %v266_v11  ;;  %v235_v23 = vmul.f32 0.00390625, %v222_v17 }
  0xd3   : > { %v280_v24 = vsel %vm279_vm3, %v278_v63, %v273_v22  ;;  %v285_v25 = vrot.slane %v234_v16, %v284_v60 }
  0xd4   : > { %v292_v27 = vrot.slane %v235_v23, %v291_v7  ;;  %v225_v28 = vpop.xlane.xlu0 %224 }
  0xd5   : > { %v287_v30 = vsel %vm286_vm4, %v285_v25, %v280_v24  ;;  %v236_v31 = vmul.f32 0.00390625, %v225_v28  ;;  %v228_v32 = vpop.xlane.xlu1 %227 }
  0xd6   : > { %v237_v33 = vmul.f32 0.00390625, %v228_v32  ;;  %v294_v35 = vsel %vm293_vm5, %v292_v27, %v287_v30 }
  0xd7   : > { %v299_v34 = vrot.slane %v236_v31, %v298_v26 }
  0xd8   : > { %v306_v36 = vrot.slane %v237_v33, %v305_v29 }
  0xd9   : > { %v301_v37 = vsel %vm300_vm6, %v299_v34, %v294_v35 }
  0xda   : > { %v308_v38 = vsel %vm307_vm7, %v306_v36, %v301_v37 }
  0xdb   : > { %670 = vmatmul.mubr.msk.f32.vlgmr.msra.gmra.mrb[0].mxu0 %vm309_vm8, %v308_v38 }
 0x1ae   : > { %v378_v41 = vpop.f32.mrb[0].mxu0 }
 0x1af   : > { %v382_v42 = vmax.f32 %v378_v41, 0.0  ;;  %v671_v43 = vpop.f32.mrb[1].mxu0 }
 0x1b1   : > { %675 = vmatmul.mubr.msk.f32.vlgmr.msra.gmra.mrb[0].mxu1 %vm384_vm10, %v382_v42 }
 0x284   : > { %v458_v44 = vpop.f32.mrb[0].mxu1 }
 0x285   : > { %v634_v45 = vmul.f32 -1.442695, %v458_v44  ;;  %v676_v46 = vpop.f32.mrb[1].mxu1 }
 0x287   : > { %742 = vpow2.f32 %v634_v45 }
 0x291   : > { %v743_v47 = vpop.eup %742 }
 0x292   : > { %v465_v48 = vadd.f32 1.0, %v743_v47 }
 0x294   : > { %744 = vrcp.f32 %v465_v48 }
 0x29e   : > { %v745_v50 = vpop.eup %744 }
 0x29f   : > { %v471_v51 = vrot.slane %v745_v50, %v470_v49 }
 0x2a1   : > { %477 = vbcast.lane.b32.xlu1 %v471_v51, 264  ;;  %473 = vbcast.lane.b32.xlu0 %v471_v51, 256 }
 0x2a5   : > { %481 = vbcast.lane.b32.xlu1 %v471_v51, 272  ;;  %489 = vbcast.lane.b32.xlu0 %v471_v51, 288 }
 0x2a9   : > { %485 = vbcast.lane.b32.xlu1 %v471_v51, 280  ;;  %497 = vbcast.lane.b32.xlu0 %v471_v51, 304 }
 0x2ad   : > { %493 = vbcast.lane.b32.xlu1 %v471_v51, 296 }
 0x2b1   : > { %501 = vbcast.lane.b32.xlu1 %v471_v51, 312 }
 0x313   : > { %v478_v52 = vpop.permute.xlu1 %477  ;;  %v474_v53 = vpop.permute.xlu0 %473 }
 0x314   : > { %v505_v54 = vmul.f32 %v478_v52, %v997_v5  ;;  %v506_v55 = vmul.f32 %v478_v52, %v999_v6  ;;  %v503_v56 = vmul.f32 %v474_v53, %v987_v0  ;;  %v504_v40 = vmul.f32 %v474_v53, %v989_v1 }
 0x316   : > { %521 = vst [vmem:[%s1080_s6 + $0x10] sm:$0xff] %v505_v54  ;;  %522 = vst [vmem:[%s1080_s6 + $0x18] sm:$0xff] %v506_v55 }
 0x317   : > { %519 = vst [vmem:[%s1080_s6] sm:$0xff] %v503_v56  ;;  %520 = vst [vmem:[%s1080_s6 + $0x8] sm:$0xff] %v504_v40  ;;  %v482_v5 = vpop.permute.xlu1 %481  ;;  %v490_v0 = vpop.permute.xlu0 %489 }
 0x318   : > { %v507_v1 = vmul.f32 %v482_v5, %v991_v2  ;;  %v508_v6 = vmul.f32 %v482_v5, %v995_v4  ;;  %v511_v57 = vmul.f32 %v490_v0, %v1011_v12  ;;  %v512_v58 = vmul.f32 %v490_v0, %v1013_v13 }
 0x31a   : > { %523 = vst [vmem:[%s1080_s6 + $0x20] sm:$0xff] %v507_v1  ;;  %524 = vst [vmem:[%s1080_s6 + $0x28] sm:$0xff] %v508_v6 }
 0x31b   : > { %527 = vst [vmem:[%s1080_s6 + $0x40] sm:$0xff] %v511_v57  ;;  %528 = vst [vmem:[%s1080_s6 + $0x48] sm:$0xff] %v512_v58  ;;  %v486_v59 = vpop.permute.xlu1 %485  ;;  %v498_v60 = vpop.permute.xlu0 %497 }
 0x31c   : > { %v509_v2 = vmul.f32 %v486_v59, %v1003_v8  ;;  %v510_v61 = vmul.f32 %v486_v59, %v1005_v9  ;;  %v515_v4 = vmul.f32 %v498_v60, %v1023_v18  ;;  %v516_v12 = vmul.f32 %v498_v60, %v1025_v19 }
 0x31e   : > { %525 = vst [vmem:[%s1080_s6 + $0x30] sm:$0xff] %v509_v2  ;;  %526 = vst [vmem:[%s1080_s6 + $0x38] sm:$0xff] %v510_v61 }
 0x31f   : > { %531 = vst [vmem:[%s1080_s6 + $0x60] sm:$0xff] %v515_v4  ;;  %532 = vst [vmem:[%s1080_s6 + $0x68] sm:$0xff] %v516_v12  ;;  %v494_v13 = vpop.permute.xlu1 %493 }
 0x320   : > { %v513_v62 = vmul.f32 %v494_v13, %v1015_v14  ;;  %v514_v63 = vmul.f32 %v494_v13, %v1017_v15 }
 0x322   : > { %529 = vst [vmem:[%s1080_s6 + $0x50] sm:$0xff] %v513_v62  ;;  %530 = vst [vmem:[%s1080_s6 + $0x58] sm:$0xff] %v514_v63 }
 0x323   : > { %v502_v8 = vpop.permute.xlu1 %501 }
 0x324   : > { %v517_v9 = vmul.f32 %v502_v8, %v1027_v20  ;;  %v518_v14 = vmul.f32 %v502_v8, %v1029_v21 }
 0x326   : > { %533 = vst [vmem:[%s1080_s6 + $0x70] sm:$0xff] %v517_v9  ;;  %534 = vst [vmem:[%s1080_s6 + $0x78] sm:$0xff] %v518_v14 }
 0x327   : > { %789 = shalt.err (!%p786_p2)
}
 0x328   : > { %s790_s28 = scalar_lea.hbm %s1111_s19, 2048  ;;  %s794_s10 = scalar_lea.hbm %s1164_s3, 4096 }
 0x329   : > { %p791_p4 = scmp.ne.s32.totalorder %s1111_s19, %s790_s28  ;;  %p795_p9 = scmp.lt.u32.totalorder %s1111_s19, %s1164_s3 }
 0x32a   : > { %p796_p1 = scmp.lt.u32.totalorder %s794_s10, %s790_s28  ;;  %p798_p6 = scmp.lt.u32.totalorder %s790_s28, %s1111_s19 }
 0x32b   : > { %p792_p5 = pnand %p791_p4, %p1171_p11 }
 0x32c   : > { %p797_p3 = por %p796_p1, %p795_p9 }
 0x32d   : > { %p793_p7 = pneg %p792_p5 }
 0x32e   : > { %p799_p12 = por %p798_p6, %p797_p3 }
 0x330   : > { %p800_p13 = pnand %p799_p12, %p793_p7 }
 0x332   : > { %803 = shalt.err (!%p800_p13)
}
 0x333   : > { %s851_s4 = smov 256   ;;  %s852_s6 = smov 16  }
 0x334   : > { %691 = dma.vmem_to_hbm [thread:$0]  (%p1171_p11), %s1113_s7, 2048, %s1111_s19, %s536_s16, %s851_s4, %s851_s4, %s852_s6  }
 0x335 PF: > { %s564_s9 = sand.u32 1, %s830_s12   ;;  %p1172_p8 = scmp.ne.s32.totalorder %s1169_s25, 0 }
 0x336   : > { %p1173_p10 = scmp.ge.s32.totalorder %s842_s15, 2  ;;  %s565_s8 = scalar_lea.sflag [#allocation4], %s564_s9 }
 0x338   : > { %p698_p0 = pnand %p1173_p10, %p1172_p8 }
 0x33a   : > { %825 = dma.done.wait (!%p698_p0), %s565_s8, 2048  }
 0x33b   : > { %827 = vsyncadd (!%p698_p0), %s565_s8, 4294965248  ;;  %p16_p2 = scmp.ge.s32.totalorder %s898_s18, 4   ;;  %s1174_s12 = smov %s834_s13 }
 0x33c   : > { %s1175_s13 = smov %s838_s14  ;;  %s1176_s14 = smov %s910_s21 }
 0x33d   : > { %s1177_s15 = smov %s898_s18  ;;  %18 = sbr.rel (!%p16_p2) target bundleno = 5 (0x5), region = 77 }
 0x344   :  { %570 = vsyncpa [#allocation3], 1 }
 0x345   :  { %572 = vsyncpa [#allocation3 + $0x1], 1 }
 0x346   :  { %573 = vsyncpa [#allocation4], 1 }
 0x347   :  { %575 = vsyncpa [#allocation4 + $0x1], 1 }

</bundles_post_ra>
